<compile_context>
chip_gen: v7x
topology: tpu7x:2x2x1
jax: 0.10.0
libtpu: 0.0.40
codegen_flags: <defaults>
</compile_context>

<pallas_src>
import functools

import jax
import jax.numpy as jnp
from jax import lax
from jax.experimental import pallas as pl
from jax.experimental.pallas import tpu as pltpu


def _round_up(x, m):
    return (x + m - 1) // m * m


def _hbm_gather_kernel(ts, nt, n_soft, ids_ref, emb_hbm, soft_hbm, out_ref, sem):
    """Gathers `ts` output rows per grid step, DMAing straight into out_ref.

    Grid: (B, nt).  Every step issues exactly `ts` row copies (D elements
    each) onto `sem`, so a single aggregate wait sized like out_ref matches
    the issued byte count exactly.

    ids_ref:  (B * nt * ts,) int32 ids in SMEM (scalar prefetch); positions
              < n_soft of each batch row hold 0 and are never read.
    emb_hbm:  (V, D) embedding table, left in HBM (memory_space=pl.ANY).
    soft_hbm: (max(n_soft, 1), D) trainable soft-prompt rows, HBM.
    out_ref:  (ts, D) output block (batch dim squeezed) -- the DMA target.
    sem:      single DMA semaphore shared by all row copies of this step.
    """
    b = pl.program_id(0)
    t = pl.program_id(1)
    base = (b * nt + t) * ts            # hoisted scalar; loop bodies only add i

    def tok_copy(i):
        pltpu.make_async_copy(
            emb_hbm.at[ids_ref[base + i]], out_ref.at[i], sem).start()

    # First tile of a batch row: rows [0, n_soft) come from the trainable soft
    # prompt, rows [n_soft, ts) from the table.  The wrapper guarantees
    # ts >= n_soft, so all loop bounds here are static (fully schedulable).
    @pl.when(t == 0)
    def _():
        if n_soft > 0:
            def sbody(i, c):
                pltpu.make_async_copy(
                    soft_hbm.at[i], out_ref.at[i], sem).start()
                return c
            lax.fori_loop(0, n_soft, sbody, 0, unroll=True)
        if n_soft < ts:
            def tbody(i, c):
                tok_copy(i)
                return c
            lax.fori_loop(n_soft, ts, tbody, 0, unroll=min(16, ts - n_soft))

    # All other tiles: pure token gather (hot path, unrolled issue loop).
    @pl.when(t > 0)
    def _():
        def body(i, c):
            tok_copy(i)
            return c
        lax.fori_loop(0, ts, body, 0, unroll=min(16, ts))

    # ONE aggregate wait: ts row copies x (D * itemsize) bytes == bytes(out_ref).
    pltpu.make_async_copy(out_ref, out_ref, sem).wait()


def _vmem_gather_kernel(ts, nt, ids_ref, emb_ref, out_ref):
    """Small-table fast path: the augmented table (soft rows appended) lives
    in VMEM; the gather is plain dynamic row indexing -- no DMA descriptors."""
    b = pl.program_id(0)
    t = pl.program_id(1)
    base = (b * nt + t) * ts

    def body(i, c):
        row = ids_ref[base + i]
        out_ref[pl.ds(i, 1), :] = emb_ref[pl.ds(row, 1), :]
        return c

    lax.fori_loop(0, ts, body, 0, unroll=min(8, ts))


def soft_prompt_embed(token_ids, emb_table, trainable_embs, *, tile_rows=256,
                      vmem_table_limit_bytes=4 * 1024 * 1024):
    """Pallas equivalent of SoftPromptEmbeddingLayer.forward."""
    B, S = token_ids.shape
    V, D = emb_table.shape
    assert trainable_embs.ndim == 3 and trainable_embs.shape[0] == 1
    assert trainable_embs.shape[2] == D
    n_soft = int(trainable_embs.shape[1])

    # torch.cat needs one dtype; use the promoted type so a wider soft-prompt
    # param is not silently downcast (review correctness note).
    out_dtype = jnp.result_type(emb_table.dtype, trainable_embs.dtype)
    emb = emb_table.astype(out_dtype)
    soft = trainable_embs.reshape(n_soft, D).astype(out_dtype)
    itemsize = jnp.dtype(out_dtype).itemsize

    tail_len = max(S - n_soft, 0)
    out_S = n_soft + tail_len           # == S in the normal case (S >= n_soft)

    # Small tables stay resident in VMEM: per-row DMAs of a few hundred bytes
    # are descriptor-overhead dominated, so vector gather wins there.
    table_rows = V + n_soft
    use_vmem_table = table_rows * D * itemsize <= vmem_table_limit_bytes

    # Tile size: the largest sublane-aligned row count whose double-buffered
    # output block (+ resident table, if any) fits a conservative VMEM budget
    # that works under v5e / v6e / v7x scoped defaults.
    sub = max(8, 32 // itemsize)        # 8 (f32), 16 (bf16), 32 (int8)
    vmem_budget = 12 * 1024 * 1024
    table_bytes = table_rows * D * itemsize if use_vmem_table else 0
    avail = max(vmem_budget - 2 * table_bytes, 2 * sub * D * itemsize)
    ts_cap = max(sub, (avail // (2 * D * itemsize)) // sub * sub)
    ts = max(sub, min(_round_up(tile_rows, sub), ts_cap, _round_up(out_S, sub)))
    # The HBM kernel keeps the whole soft prompt inside the first tile so its
    # loop bounds stay static.  Fine for realistic soft-prompt lengths.
    ts = max(ts, _round_up(max(n_soft, 1), sub))
    nt = -(-out_S // ts)                # cdiv; the last tile may be partial
    s_pad = nt * ts

    # Token ids, remapped + flattened to 1-D for SMEM scalar prefetch.
    #   soft positions: VMEM path -> virtual rows V..V+n_soft-1; HBM path -> 0
    #                   (never read).
    #   padded tail:    0 (a valid row; Pallas clips the partial last block on
    #                   writeback, so those gathered rows are discarded).
    # NOTE: scalar prefetch keeps all B*s_pad ids in SMEM; for extremely long
    # B*S a per-tile SMEM BlockSpec would bound that instead.
    tail_ids = token_ids[:, n_soft:].astype(jnp.int32)
    if use_vmem_table:
        lead = jnp.broadcast_to(
            jnp.arange(V, V + n_soft, dtype=jnp.int32), (B, n_soft))
    else:
        lead = jnp.zeros((B, n_soft), jnp.int32)
    ids = jnp.concatenate([lead, tail_ids], axis=1)
    if s_pad > out_S:
        ids = jnp.pad(ids, ((0, 0), (0, s_pad - out_S)))
    ids_flat = ids.reshape(-1)

    out_shape = jax.ShapeDtypeStruct((B, out_S, D), out_dtype)
    out_spec = pl.BlockSpec((None, ts, D), lambda b, t, ids_s: (b, t, 0))
    cparams = pltpu.CompilerParams(
        # No cross-step state -> both axes may be split across cores (keeps
        # v7x megacore busy even at B == 1).
        dimension_semantics=("parallel", "parallel"),
        vmem_limit_bytes=32 * 1024 * 1024,
    )

    if use_vmem_table:
        emb_aug = jnp.concatenate([emb, soft], axis=0)   # (V + n_soft, D), small
        grid_spec = pltpu.PrefetchScalarGridSpec(
            num_scalar_prefetch=1,
            grid=(B, nt),
            in_specs=[pl.BlockSpec((table_rows, D), lambda b, t, ids_s: (0, 0))],
            out_specs=out_spec,
        )
        kernel = functools.partial(_vmem_gather_kernel, ts, nt)
        return pl.pallas_call(kernel, out_shape=out_shape, grid_spec=grid_spec,
                              compiler_params=cparams)(ids_flat, emb_aug)

    soft_rows = soft if n_soft > 0 else jnp.zeros((1, D), out_dtype)
    grid_spec = pltpu.PrefetchScalarGridSpec(
        num_scalar_prefetch=1,
        grid=(B, nt),
        in_specs=[
            pl.BlockSpec(memory_space=pl.ANY),   # embedding table stays in HBM
            pl.BlockSpec(memory_space=pl.ANY),   # soft-prompt rows, HBM
        ],
        out_specs=out_spec,
        scratch_shapes=[pltpu.SemaphoreType.DMA],
    )
    kernel = functools.partial(_hbm_gather_kernel, ts, nt, n_soft)
    return pl.pallas_call(kernel, out_shape=out_shape, grid_spec=grid_spec,
                          compiler_params=cparams)(ids_flat, emb, soft_rows)


if __name__ == "__main__":
    # Small, deterministic synthetic shapes consistent with the module.
    B, S, D, V, N_SOFT = 2, 8, 128, 64, 3

    key = jax.random.PRNGKey(0)
    k_emb, k_soft, k_ids = jax.random.split(key, 3)

    emb_table = jax.random.normal(k_emb, (V, D), dtype=jnp.float32)           # nn.Embedding weight
    trainable = jax.random.normal(k_soft, (1, N_SOFT, D), dtype=jnp.float32)  # soft-prompt param
    token_ids = jax.random.randint(k_ids, (B, S), 0, V, dtype=jnp.int32)      # x: (batch, seq)

    # Pure-JAX reference of the PyTorch forward.
    ref = jnp.concatenate(
        [jnp.broadcast_to(trainable, (B, N_SOFT, D)),
         emb_table[token_ids[:, N_SOFT:]]],
        axis=1,
    )

    # Small-table fast path (table resident in VMEM).
    out_vmem = jax.block_until_ready(
        soft_prompt_embed(token_ids, emb_table, trainable))
    # Large-table path (per-row HBM DMA gather), forced for coverage.
    out_hbm = jax.block_until_ready(
        soft_prompt_embed(token_ids, emb_table, trainable,
                          vmem_table_limit_bytes=0))

    assert out_vmem.shape == (B, S, D), out_vmem.shape
    assert out_hbm.shape == (B, S, D), out_hbm.shape
    # Pure copies -- require exact equality, not allclose.
    assert bool(jnp.array_equal(out_vmem, ref)), "VMEM-path mismatch vs reference"
    assert bool(jnp.array_equal(out_hbm, ref)), "HBM-path mismatch vs reference"
    print("KERNEL_OK")
</pallas_src>

<mosaic_0001>
module attributes {stable_mosaic.version = 11 : i64} {
  func.func @_vmem_gather_kernel(%arg0: i32, %arg1: i32, %arg2: memref<16xi32, #tpu.memory_space<smem>>, %arg3: memref<67x128xf32, #tpu.memory_space<vmem>>, %arg4: memref<1x8x128xf32, #tpu.memory_space<vmem>>) attributes {dimension_semantics = [#tpu.dimension_semantics<parallel>, #tpu.dimension_semantics<parallel>], iteration_bounds = array<i64: 2, 1>, scalar_prefetch = 1 : i64, scratch_operands = 0 : i64, tpu.core_type = #tpu.core_type<tc>, window_params = [{pipeline_mode = #tpu.pipeline_mode<synchronous>, transform_indices = @transform_0, window_bounds = array<i64: 67, 128>}, {transform_indices = @transform_1, window_bounds = array<i64: 1, 8, 128>}]} {
    %c1_i32 = arith.constant 1 : i32
    %0 = arith.muli %arg0, %c1_i32 : i32
    %1 = arith.addi %0, %arg1 : i32
    %c8_i32 = arith.constant 8 : i32
    %2 = arith.muli %1, %c8_i32 : i32
    %c0_i32 = arith.constant 0 : i32
    %3 = arith.addi %2, %c0_i32 : i32
    %4 = arith.index_cast %3 : i32 to index
    %5 = memref.load %arg2[%4] : memref<16xi32, #tpu.memory_space<smem>>
    %6 = arith.index_cast %5 : i32 to index
    %c0 = arith.constant 0 : index
    %7 = vector.load %arg3[%6, %c0] : memref<67x128xf32, #tpu.memory_space<vmem>>, vector<1x128xf32>
    %c0_0 = arith.constant 0 : index
    %8 = arith.index_cast %c0_i32 : i32 to index
    %c0_1 = arith.constant 0 : index
    %9 = vector.load %arg4[%c0_0, %8, %c0_1] : memref<1x8x128xf32, #tpu.memory_space<vmem>>, vector<1x1x128xf32>
    %10 = vector.shape_cast %9 : vector<1x1x128xf32> to vector<1x128xf32>
    %11 = vector.shape_cast %7 : vector<1x128xf32> to vector<1x1x128xf32>
    tpu.vector_store %arg4[%c0_0, %8, %c0_1], %11 {strides = array<i32>} : memref<1x8x128xf32, #tpu.memory_space<vmem>>, vector<1x1x128xf32>,
    %c1_i32_2 = arith.constant 1 : i32
    %12 = arith.addi %2, %c1_i32_2 : i32
    %13 = arith.index_cast %12 : i32 to index
    %14 = memref.load %arg2[%13] : memref<16xi32, #tpu.memory_space<smem>>
    %15 = arith.index_cast %14 : i32 to index
    %c0_3 = arith.constant 0 : index
    %16 = vector.load %arg3[%15, %c0_3] : memref<67x128xf32, #tpu.memory_space<vmem>>, vector<1x128xf32>
    %c0_4 = arith.constant 0 : index
    %17 = arith.index_cast %c1_i32_2 : i32 to index
    %c0_5 = arith.constant 0 : index
    %18 = vector.load %arg4[%c0_4, %17, %c0_5] : memref<1x8x128xf32, #tpu.memory_space<vmem>>, vector<1x1x128xf32>
    %19 = vector.shape_cast %18 : vector<1x1x128xf32> to vector<1x128xf32>
    %20 = vector.shape_cast %16 : vector<1x128xf32> to vector<1x1x128xf32>
    tpu.vector_store %arg4[%c0_4, %17, %c0_5], %20 {strides = array<i32>} : memref<1x8x128xf32, #tpu.memory_space<vmem>>, vector<1x1x128xf32>,
    %c2_i32 = arith.constant 2 : i32
    %21 = arith.addi %2, %c2_i32 : i32
    %22 = arith.index_cast %21 : i32 to index
    %23 = memref.load %arg2[%22] : memref<16xi32, #tpu.memory_space<smem>>
    %24 = arith.index_cast %23 : i32 to index
    %c0_6 = arith.constant 0 : index
    %25 = vector.load %arg3[%24, %c0_6] : memref<67x128xf32, #tpu.memory_space<vmem>>, vector<1x128xf32>
    %c0_7 = arith.constant 0 : index
    %26 = arith.index_cast %c2_i32 : i32 to index
    %c0_8 = arith.constant 0 : index
    %27 = vector.load %arg4[%c0_7, %26, %c0_8] : memref<1x8x128xf32, #tpu.memory_space<vmem>>, vector<1x1x128xf32>
    %28 = vector.shape_cast %27 : vector<1x1x128xf32> to vector<1x128xf32>
    %29 = vector.shape_cast %25 : vector<1x128xf32> to vector<1x1x128xf32>
    tpu.vector_store %arg4[%c0_7, %26, %c0_8], %29 {strides = array<i32>} : memref<1x8x128xf32, #tpu.memory_space<vmem>>, vector<1x1x128xf32>,
    %c3_i32 = arith.constant 3 : i32
    %30 = arith.addi %2, %c3_i32 : i32
    %31 = arith.index_cast %30 : i32 to index
    %32 = memref.load %arg2[%31] : memref<16xi32, #tpu.memory_space<smem>>
    %33 = arith.index_cast %32 : i32 to index
    %c0_9 = arith.constant 0 : index
    %34 = vector.load %arg3[%33, %c0_9] : memref<67x128xf32, #tpu.memory_space<vmem>>, vector<1x128xf32>
    %c0_10 = arith.constant 0 : index
    %35 = arith.index_cast %c3_i32 : i32 to index
    %c0_11 = arith.constant 0 : index
    %36 = vector.load %arg4[%c0_10, %35, %c0_11] : memref<1x8x128xf32, #tpu.memory_space<vmem>>, vector<1x1x128xf32>
    %37 = vector.shape_cast %36 : vector<1x1x128xf32> to vector<1x128xf32>
    %38 = vector.shape_cast %34 : vector<1x128xf32> to vector<1x1x128xf32>
    tpu.vector_store %arg4[%c0_10, %35, %c0_11], %38 {strides = array<i32>} : memref<1x8x128xf32, #tpu.memory_space<vmem>>, vector<1x1x128xf32>,
    %c4_i32 = arith.constant 4 : i32
    %39 = arith.addi %2, %c4_i32 : i32
    %40 = arith.index_cast %39 : i32 to index
    %41 = memref.load %arg2[%40] : memref<16xi32, #tpu.memory_space<smem>>
    %42 = arith.index_cast %41 : i32 to index
    %c0_12 = arith.constant 0 : index
    %43 = vector.load %arg3[%42, %c0_12] : memref<67x128xf32, #tpu.memory_space<vmem>>, vector<1x128xf32>
    %c0_13 = arith.constant 0 : index
    %44 = arith.index_cast %c4_i32 : i32 to index
    %c0_14 = arith.constant 0 : index
    %45 = vector.load %arg4[%c0_13, %44, %c0_14] : memref<1x8x128xf32, #tpu.memory_space<vmem>>, vector<1x1x128xf32>
    %46 = vector.shape_cast %45 : vector<1x1x128xf32> to vector<1x128xf32>
    %47 = vector.shape_cast %43 : vector<1x128xf32> to vector<1x1x128xf32>
    tpu.vector_store %arg4[%c0_13, %44, %c0_14], %47 {strides = array<i32>} : memref<1x8x128xf32, #tpu.memory_space<vmem>>, vector<1x1x128xf32>,
    %c5_i32 = arith.constant 5 : i32
    %48 = arith.addi %2, %c5_i32 : i32
    %49 = arith.index_cast %48 : i32 to index
    %50 = memref.load %arg2[%49] : memref<16xi32, #tpu.memory_space<smem>>
    %51 = arith.index_cast %50 : i32 to index
    %c0_15 = arith.constant 0 : index
    %52 = vector.load %arg3[%51, %c0_15] : memref<67x128xf32, #tpu.memory_space<vmem>>, vector<1x128xf32>
    %c0_16 = arith.constant 0 : index
    %53 = arith.index_cast %c5_i32 : i32 to index
    %c0_17 = arith.constant 0 : index
    %54 = vector.load %arg4[%c0_16, %53, %c0_17] : memref<1x8x128xf32, #tpu.memory_space<vmem>>, vector<1x1x128xf32>
    %55 = vector.shape_cast %54 : vector<1x1x128xf32> to vector<1x128xf32>
    %56 = vector.shape_cast %52 : vector<1x128xf32> to vector<1x1x128xf32>
    tpu.vector_store %arg4[%c0_16, %53, %c0_17], %56 {strides = array<i32>} : memref<1x8x128xf32, #tpu.memory_space<vmem>>, vector<1x1x128xf32>,
    %c6_i32 = arith.constant 6 : i32
    %57 = arith.addi %2, %c6_i32 : i32
    %58 = arith.index_cast %57 : i32 to index
    %59 = memref.load %arg2[%58] : memref<16xi32, #tpu.memory_space<smem>>
    %60 = arith.index_cast %59 : i32 to index
    %c0_18 = arith.constant 0 : index
    %61 = vector.load %arg3[%60, %c0_18] : memref<67x128xf32, #tpu.memory_space<vmem>>, vector<1x128xf32>
    %c0_19 = arith.constant 0 : index
    %62 = arith.index_cast %c6_i32 : i32 to index
    %c0_20 = arith.constant 0 : index
    %63 = vector.load %arg4[%c0_19, %62, %c0_20] : memref<1x8x128xf32, #tpu.memory_space<vmem>>, vector<1x1x128xf32>
    %64 = vector.shape_cast %63 : vector<1x1x128xf32> to vector<1x128xf32>
    %65 = vector.shape_cast %61 : vector<1x128xf32> to vector<1x1x128xf32>
    tpu.vector_store %arg4[%c0_19, %62, %c0_20], %65 {strides = array<i32>} : memref<1x8x128xf32, #tpu.memory_space<vmem>>, vector<1x1x128xf32>,
    %c7_i32 = arith.constant 7 : i32
    %66 = arith.addi %2, %c7_i32 : i32
    %67 = arith.index_cast %66 : i32 to index
    %68 = memref.load %arg2[%67] : memref<16xi32, #tpu.memory_space<smem>>
    %69 = arith.index_cast %68 : i32 to index
    %c0_21 = arith.constant 0 : index
    %70 = vector.load %arg3[%69, %c0_21] : memref<67x128xf32, #tpu.memory_space<vmem>>, vector<1x128xf32>
    %c0_22 = arith.constant 0 : index
    %71 = arith.index_cast %c7_i32 : i32 to index
    %c0_23 = arith.constant 0 : index
    %72 = vector.load %arg4[%c0_22, %71, %c0_23] : memref<1x8x128xf32, #tpu.memory_space<vmem>>, vector<1x1x128xf32>
    %73 = vector.shape_cast %72 : vector<1x1x128xf32> to vector<1x128xf32>
    %74 = vector.shape_cast %70 : vector<1x128xf32> to vector<1x1x128xf32>
    tpu.vector_store %arg4[%c0_22, %71, %c0_23], %74 {strides = array<i32>} : memref<1x8x128xf32, #tpu.memory_space<vmem>>, vector<1x1x128xf32>,
    %c8_i32_24 = arith.constant 8 : i32
    return
  }
  func.func @transform_0(%arg0: i32, %arg1: i32, %arg2: memref<16xi32, #tpu.memory_space<smem>>) -> (i32, i32) {
    %c0_i32 = arith.constant 0 : i32
    %c0_i32_0 = arith.constant 0 : i32
    %c0_i32_1 = arith.constant 0 : i32
    return %c0_i32, %c0_i32_0 : i32, i32
  }
  func.func @transform_1(%arg0: i32, %arg1: i32, %arg2: memref<16xi32, #tpu.memory_space<smem>>) -> (i32, i32, i32) {
    %c0_i32 = arith.constant 0 : i32
    %c0_i32_0 = arith.constant 0 : i32
    return %arg0, %arg1, %c0_i32 : i32, i32, i32
  }
}

</mosaic_0001>

<bundles_post_ra>
// kernel: tpu_custom_call.1
= control target key start
LH: loop header
LB: loop body
LE: loop exit
PB: predicated region body
PF: predicated region fallthrough
CT: control target
= control target key end

     0   :  { %s648_s0 = inlined_call_operand.hbm [shape: s32[16], index: 0, kind: input, shape index: {}]   ;;  %s649_s1 = inlined_call_operand.hbm [shape: f32[67,128], index: 1, kind: input, shape index: {}]   ;;  %s650_s2 = inlined_call_operand.hbm [shape: f32[2,8,128], index: 2, kind: output, shape index: {}]  }
   0x1   :  { %656 = sst [smem:[#allocation11_spill]] %s649_s1  ;;  %s342_s11 = scalar_lea.hbm %s648_s0, 16 }
   0x2   :  { %p343_p0 = scmp.ne.s32.totalorder %s648_s0, %s342_s11  ;;  %p346_p1 = scmp.lt.u32.totalorder %s342_s11, %s648_s0 }
   0x4   :  { %p348_p2 = pnand %p346_p1, %p343_p0 }
   0x6   :  { %351 = shalt.err (!%p348_p2)  }
   0x7   :  { %s466_s16 = smov [#allocation3]  }
   0x8   :  { %8 = dma.hbm_to_smem %s648_s0, 16, %s466_s16, [#allocation2] }
   0x9   :  { %432 = dma.done.wait [#allocation2], 16 }
   0xa   :  { %433 = vsyncadd [#allocation2], 4294967280 }
   0xb   :  { %10 = sfence }
   0xc   :  { %11 = vsyncpa [#allocation5], 0 }
   0xd   :  { %12 = vsyncpa [#allocation6], 0 }
   0xe   :  { %14 = vsyncpa [#allocation6 + $0x1], 0  ;;  %s498_s19 = smov 0   ;;  %s500_s20 = smov 0  }
   0xf   :  { %s502_s21 = smov 0   ;;  %s504_s22 = smov 0  }
  0x10   :  { %s506_s23 = smov 0   ;;  %s508_s24 = smov 0  }
  0x11 LB: > { %s261_s0 = sadd.s32 4294967295, %s464_s24   ;;  %s262_s25 = sadd.s32 4294967294, %s464_s24   ;;  %s464_s24 = sphi %s508_s24, %s20_s24   ;;  %s460_s23 = sphi %s506_s23, %s672_s23   ;;  %s456_s22 = sphi %s504_s22, %s671_s22   ;;  %s452_s21 = sphi %s502_s21, %s670_s21   ;;  %s448_s20 = sphi %s500_s20, %s669_s20   ;;  %s444_s19 = sphi %s498_s19, %s668_s19  }
  0x12   : > { %s32_s26 = sadd.s32 1, %s460_s23  ;;  %s62_s27 = sadd.s32 1, %s452_s21 }
  0x13   : > { %p34_p3 = scmp.ge.s32.totalorder %s32_s26, 2  ;;  %p72_p4 = scmp.ne.s32.totalorder %s452_s21, %s448_s20 }
  0x14   : > { %p73_p5 = scmp.eq.s32.totalorder %s261_s0, 1  ;;  %p78_p6 = scmp.ne.s32.totalorder %s448_s20, %s444_s19 }
  0x15   : > { %s674_s26 = smov (%p34_p3, %s32_s26), 0  ;;  %p79_p8 = scmp.eq.s32.totalorder %s262_s25, 1 }
  0x16   : > { %p538_p7 = por %p73_p5, %p72_p4  ;;  %s57_s29 = ssub.s32 %s460_s23, %s674_s26 }
  0x17   : > { %p263_p9 = scmp.ge.s32.totalorder %s464_s24, 1  ;;  %p60_p10 = scmp.eq.s32.totalorder %s57_s29, 0 }
  0x18   : > { %s657_s28 = scalar_select %p538_p7, 1, 0 }
  0x19   : > { %p545_p11 = por %p79_p8, %p78_p6  ;;  %p86_p12 = scmp.lt.s32.totalorder %s464_s24, 3 }
  0x1a   : > { %s551_s3 = scalar_select %p60_p10, %s452_s21, %s62_s27  }
  0x1b   : > { %s658_s30 = scalar_select %p545_p11, 1, 0 }
  0x1c   : > { %p553_p13 = pnand %p263_p9, %p86_p12  ;;  %p557_p0 = scmp.eq.s32.totalorder %s261_s0, 0 }
  0x1d   : > { %s467_s6 = smov [#allocation4]   ;;  %s662_s1 = sld [smem:[#allocation11_spill]] }
  0x1e   : > { %s659_s4 = scalar_select %p553_p13, 1, 0 }
  0x1f   : > { %s660_s5 = scalar_select %p557_p0, 1, 0 }
  0x20   : > { %p279_p1 = pneg %p553_p13  ;;  %s98_s7 = sshll.u32 %s467_s6, 4  ;;  %s99_s7 = int_to_ptr.vmem [resolvable:$true] %s98_s7 }
  0x22   : > { %p565_p2 = pnand %p557_p0, %p279_p1 }
  0x23   : > { %s352_s11 = scalar_lea.hbm %s662_s1, 1152 }
  0x24   : > { %p353_p3 = scmp.ne.s32.totalorder %s662_s1, %s352_s11  ;;  %p354_p4 = pneg %p565_p2 }
  0x25   : > { %p359_p8 = scmp.lt.u32.totalorder %s352_s11, %s662_s1 }
  0x26   : > { %p355_p5 = pnand %p354_p4, %p353_p3 }
  0x28   : > { %p356_p6 = pneg %p355_p5 }
  0x2a   : > { %p361_p9 = pnand %p359_p8, %p356_p6 }
  0x2c   : > { %364 = shalt.err (!%p361_p9)
}
  0x2d   : > { %s365_s16 = scalar_lea.vmem %s99_s7, 1152  ;;  %p373_p11 = scmp.lt.s32.totalorder %s99_s7, %s99_s7 }
  0x2e   : > { %p366_p10 = scmp.ne.s32.totalorder %s99_s7, %s365_s16  ;;  %p374_p7 = scmp.lt.s32.totalorder %s365_s16, %s365_s16 }
  0x30   : > { %p368_p12 = pnand %p366_p10, %p354_p4  ;;  %p375_p0 = por %p374_p7, %p373_p11 }
  0x32   : > { %p369_p1 = pneg %p368_p12 }
  0x34   : > { %p376_p13 = pnand %p375_p0, %p369_p1 }
  0x36   : > { %379 = shalt.err (!%p376_p13)
}
  0x37   : > { %s468_s17 = smov 128   ;;  %s469_s18 = smov 8  }
  0x38   : > { %282 = dma.hbm_to_vmem [thread:$0]  (!%p565_p2), %s662_s1, 1152, %s99_s7, [#allocation5], %s468_s17, %s468_s17, %s469_s18  }
  0x39   : > { %p663_p3 = scmp.ne.s32.totalorder %s659_s4, 0 }
  0x3a   : > { %p664_p5 = scmp.ne.s32.totalorder (!%p663_p3), %s660_s5, 0 }
  0x3b   : > { %114 = sbr.rel (%p663_p3) target bundleno = 106 (0x6a), region = 24 }
  0x42   : > { %435 = dma.done.wait (%p664_p5), [#allocation5], 1152  }
  0x43   : > { %437 = vsyncadd (%p664_p5), [#allocation5], 4294966144  ;;  %s655_s27 = sand.u32 1, %s448_s20   ;;  %s268_s29 = sshll.u32 %s456_s22, 3 }
  0x44   : > { %s267_s6 = sshll.u32 %s655_s27, 3  ;;  %s131_s8 = sld [smem:[#allocation3 + %s268_s29]] }
  0x45   : > { %s135_s9 = sadd.s32 1, %s268_s29  ;;  %s140_s10 = sadd.s32 2, %s268_s29 }
  0x46   : > { %s136_s7 = sld [smem:[#allocation3 + %s135_s9]]  ;;  %s145_s4 = sadd.s32 3, %s268_s29 }
  0x47   : > { %s141_s11 = sld [smem:[#allocation3 + %s140_s10]]  ;;  %s150_s12 = sadd.s32 4, %s268_s29 }
  0x48   : > { %s146_s13 = sld [smem:[#allocation3 + %s145_s4]]  ;;  %s155_s15 = sadd.s32 5, %s268_s29 }
  0x49   : > { %s151_s14 = sld [smem:[#allocation3 + %s150_s12]]  ;;  %s160_s17 = sadd.s32 6, %s268_s29 }
  0x4a   : > { %s132_s16 = scalar_lea.vmem [#allocation4], %s131_s8  ;;  %s156_s5 = sld [smem:[#allocation3 + %s155_s15]] }
  0x4b   : > { %v133_v0 = vld [vmem:[%s132_s16] sm:$0x1]  ;;  %s128_s18 = scalar_lea.vmem [#allocation7], %s267_s6  ;;  %s161_s0 = sld [smem:[#allocation3 + %s160_s17]] }
  0x4c   : > { %134 = vst [vmem:[%s128_s18] sm:$0x1] %v133_v0  ;;  %s165_s25 = sadd.s32 7, %s268_s29  ;;  %s137_s27 = scalar_lea.vmem [#allocation4], %s136_s7 }
  0x4d   : > { %v138_v1 = vld [vmem:[%s137_s27] sm:$0x1]  ;;  %s142_s1 = scalar_lea.vmem [#allocation4], %s141_s11  ;;  %s166_s9 = sld [smem:[#allocation3 + %s165_s25]] }
  0x4e   : > { %v143_v2 = vld [vmem:[%s142_s1] sm:$0x1]  ;;  %139 = vst [vmem:[%s128_s18 + $0x1] sm:$0x1] %v138_v1  ;;  %s147_s10 = scalar_lea.vmem [#allocation4], %s146_s13  ;;  %s270_s8 = sshll.u32 %s456_s22, 7 }
  0x4f   : > { %144 = vst [vmem:[%s128_s18 + $0x2] sm:$0x1] %v143_v2  ;;  %v148_v3 = vld [vmem:[%s147_s10] sm:$0x1]  ;;  %s152_s4 = scalar_lea.vmem [#allocation4], %s151_s14  ;;  %s185_s6 = sshll.u32 %s128_s18, 4  ;;  %s601_s6 = int_to_ptr.vmem [resolvable:$true] %s185_s6 }
  0x50   : > { %v153_v4 = vld [vmem:[%s152_s4] sm:$0x1]  ;;  %149 = vst [vmem:[%s128_s18 + $0x3] sm:$0x1] %v148_v3  ;;  %s157_s12 = scalar_lea.vmem [#allocation4], %s156_s5  ;;  %s599_s7 = scalar_lea.hbm %s650_s2, %s270_s8 }
  0x51   : > { %154 = vst [vmem:[%s128_s18 + $0x4] sm:$0x1] %v153_v4  ;;  %v158_v5 = vld [vmem:[%s157_s12] sm:$0x1]  ;;  %s162_s29 = scalar_lea.vmem [#allocation4], %s161_s0  ;;  %s665_s11 = sand.u32 1, %s448_s20  }
  0x52   : > { %159 = vst [vmem:[%s128_s18 + $0x5] sm:$0x1] %v158_v5  ;;  %v163_v6 = vld [vmem:[%s162_s29] sm:$0x1]  ;;  %s171_s13 = scalar_lea.sflag [#allocation6], %s665_s11  ;;  %s380_s14 = scalar_lea.vmem %s601_s6, 128 }
  0x53   : > { %164 = vst [vmem:[%s128_s18 + $0x6] sm:$0x1] %v163_v6  ;;  %s167_s22 = scalar_lea.vmem [#allocation4], %s166_s9  ;;  %p381_p7 = scmp.ne.s32.totalorder %s601_s6, %s380_s14 }
  0x54   : > { %v168_v7 = vld [vmem:[%s167_s22] sm:$0x1]  ;;  %p666_p11 = scmp.ne.s32.totalorder %s657_s28, 0  ;;  %s470_s15 = smov [#allocation7]  }
  0x55   : > { %169 = vst [vmem:[%s128_s18 + $0x7] sm:$0x1] %v168_v7  ;;  %s384_s16 = sshll.u32 %s470_s15, 4  ;;  %s385_s16 = int_to_ptr.vmem [resolvable:$false] %s384_s16 }
  0x56   : > { %p382_p13 = pnand %p381_p7, %p666_p11  ;;  %s386_s5 = scalar_lea.vmem %s385_s16, 256 }
  0x57   : > { %p387_p2 = scmp.lt.s32.totalorder %s601_s6, %s385_s16  ;;  %p388_p4 = scmp.lt.s32.totalorder %s386_s5, %s380_s14 }
  0x58   : > { %p383_p0 = pneg %p382_p13 }
  0x59   : > { %p389_p6 = por %p388_p4, %p387_p2 }
  0x5b   : > { %p390_p8 = pnand %p389_p6, %p383_p0 }
  0x5d   : > { %393 = shalt.err (!%p390_p8)
}
  0x5e   : > { %s394_s17 = scalar_lea.hbm %s599_s7, 128  ;;  %s398_s25 = scalar_lea.hbm %s650_s2, 256 }
  0x5f   : > { %p395_p9 = scmp.ne.s32.totalorder %s599_s7, %s394_s17  ;;  %p399_p1 = scmp.lt.u32.totalorder %s599_s7, %s650_s2 }
  0x60   : > { %p400_p3 = scmp.lt.u32.totalorder %s398_s25, %s394_s17  ;;  %p402_p7 = scmp.lt.u32.totalorder %s394_s17, %s599_s7 }
  0x61   : > { %p396_p10 = pnand %p395_p9, %p666_p11 }
  0x62   : > { %p401_p5 = por %p400_p3, %p399_p1 }
  0x63   : > { %p397_p12 = pneg %p396_p10 }
  0x64   : > { %p403_p13 = por %p402_p7, %p401_p5 }
  0x66   : > { %p404_p0 = pnand %p403_p13, %p397_p12 }
  0x68   : > { %407 = shalt.err (!%p404_p0)
}
  0x69   : > { %277 = dma.vmem_to_hbm [thread:$0]  (%p666_p11), %s601_s6, 128, %s599_s7, %s171_s13  }
  0x6a PF: > { %p289_p2 = scmp.ge.s32.totalorder %s464_s24, 2  ;;  %s197_s4 = sand.u32 1, %s444_s19  }
  0x6b   : > { %p667_p4 = scmp.ne.s32.totalorder %s658_s30, 0  ;;  %s198_s8 = scalar_lea.sflag [#allocation6], %s197_s4 }
  0x6d   : > { %p284_p6 = pnand %p289_p2, %p667_p4 }
  0x6f   : > { %439 = dma.done.wait (!%p284_p6), %s198_s8, 128  }
  0x70   : > { %441 = vsyncadd (!%p284_p6), %s198_s8, 4294967168  ;;  %s20_s24 = sadd.s32 1, %s464_s24   ;;  %s668_s19 = smov %s448_s20 }
  0x71   : > { %p17_p8 = scmp.ge.s32.totalorder %s20_s24, 4   ;;  %s669_s20 = smov %s452_s21 }
  0x72   : > { %s670_s21 = smov %s551_s3  ;;  %s671_s22 = smov %s460_s23 }
  0x73   : > { %s672_s23 = smov %s674_s26  ;;  %19 = sbr.rel (!%p17_p8) target bundleno = 17 (0x11), region = 69 }
  0x7a   :  { %203 = vsyncpa [#allocation5], 1 }
  0x7b   :  { %205 = vsyncpa [#allocation5 + $0x1], 1 }
  0x7c   :  { %206 = vsyncpa [#allocation6], 1 }
  0x7d   :  { %208 = vsyncpa [#allocation6 + $0x1], 1 }

</bundles_post_ra>
